<compile_context>
chip_gen: v7x
topology: tpu7x:2x2x1
jax: 0.10.0
libtpu: 0.0.40
codegen_flags: <defaults>
</compile_context>

<pallas_src>
import jax
import jax.numpy as jnp
from jax.experimental import pallas as pl
from jax.experimental.pallas import tpu as pltpu


def _model_kernel(s_ref, in_ref, out_ref):
    # in_ref : (3, N) rows = [x1, x2, x3]   (flattened, lane-dense)
    # out_ref: (3, N) rows = [x5, x1 + 20, x3-passthrough]; HBM-aliased to in_ref.
    x = in_ref[...]                      # single full-block VMEM load
    x1 = x[0:1, :]
    x2 = x[1:2, :]
    x3 = x[2:3, :]
    # x4 = x3 * rand(1) ; x5 = x2 * x4   (scalar comes straight from SMEM)
    out_ref[0:1, :] = x2 * (x3 * s_ref[0])
    # two loops of `for i in range(10): x1 += 1`  ->  net in-place x1 += 20
    out_ref[1:2, :] = x1 + jnp.float32(20.0)
    # keep the aliased third row fully defined (never read back by the wrapper)
    out_ref[2:3, :] = x3


@jax.jit
def model_forward(x1, x2, x3, s):
    """Returns (x5, x1_after_inplace_updates)."""
    if x1.shape != x2.shape:
        raise ValueError(
            f"x1 shape {x1.shape} is not broadcast-compatible with x2 shape "
            f"{x2.shape}; the PyTorch forward would raise here too."
        )
    n = x1.size
    # Pack the three operands into one lane-dense slab -> one input DMA.
    packed = jnp.stack(
        [x1.reshape(n).astype(jnp.float32),
         x2.reshape(n).astype(jnp.float32),
         x3.reshape(n).astype(jnp.float32)],
        axis=0,
    )  # (3, n)

    out = pl.pallas_call(
        _model_kernel,
        out_shape=jax.ShapeDtypeStruct((3, n), jnp.float32),
        in_specs=[
            pl.BlockSpec(memory_space=pltpu.MemorySpace.SMEM),   # s: (1,) scalar
            pl.BlockSpec(memory_space=pltpu.MemorySpace.VMEM),   # packed [x1; x2; x3]
        ],
        out_specs=pl.BlockSpec(memory_space=pltpu.MemorySpace.VMEM),
        # Reuse the packed input's HBM buffer for the output ("in-place" x1 semantics,
        # no second allocation / extra writeback buffer).
        input_output_aliases={1: 0},
        cost_estimate=pl.CostEstimate(
            flops=3 * n,                         # 2 muls + 1 add per element
            transcendentals=0,
            bytes_accessed=(3 * n + 3 * n + 1) * 4,
        ),
    )(s, packed)

    x5 = out[0].reshape(x2.shape)
    x1_new = out[1].reshape(x1.shape)
    return x5, x1_new


if __name__ == "__main__":
    key = jax.random.PRNGKey(0)
    k1, k2, k3, k4 = jax.random.split(key, 4)

    # Deterministic stand-ins for torch.randn / torch.rand_like / torch.rand.
    x1 = jax.random.normal(k1, (1, 2, 3), dtype=jnp.float32)   # forward input
    x2 = jax.random.normal(k2, (1, 2, 3), dtype=jnp.float32)   # torch.randn(1,2,3)
    x3 = jax.random.uniform(k3, (1, 2, 3), dtype=jnp.float32)  # torch.rand_like(x1)
    s = jax.random.uniform(k4, (1,), dtype=jnp.float32)        # torch.rand(1)

    x5, x1_new = model_forward(x1, x2, x3, s)
    jax.block_until_ready((x5, x1_new))

    # Correctness check against the pure-JAX reference of the forward semantics.
    x5_ref = x2 * (x3 * s[0])
    x1_ref = x1 + 20.0
    assert jnp.allclose(x5, x5_ref, atol=1e-6), "x5 mismatch"
    assert jnp.allclose(x1_new, x1_ref, atol=1e-6), "x1 side-effect mismatch"
    assert x5.shape == (1, 2, 3) and x5.dtype == jnp.float32

    print("KERNEL_OK")
</pallas_src>

<mosaic_0001>
module attributes {stable_mosaic.version = 11 : i64} {
  func.func @_model_kernel(%arg0: memref<1xf32, #tpu.memory_space<smem>>, %arg1: memref<3x6xf32, #tpu.memory_space<vmem>>, %arg2: memref<3x6xf32, #tpu.memory_space<vmem>>) attributes {dimension_semantics = [], scalar_prefetch = 0 : i64, scratch_operands = 0 : i64, tpu.core_type = #tpu.core_type<tc>} {
    %c0 = arith.constant 0 : index
    %c0_0 = arith.constant 0 : index
    %0 = vector.load %arg1[%c0, %c0_0] : memref<3x6xf32, #tpu.memory_space<vmem>>, vector<3x6xf32>
    %1 = vector.extract_strided_slice %0 {offsets = [0, 0], sizes = [1, 6], strides = [1, 1]} : vector<3x6xf32> to vector<1x6xf32>
    %2 = vector.extract_strided_slice %0 {offsets = [1, 0], sizes = [1, 6], strides = [1, 1]} : vector<3x6xf32> to vector<1x6xf32>
    %3 = vector.extract_strided_slice %0 {offsets = [2, 0], sizes = [1, 6], strides = [1, 1]} : vector<3x6xf32> to vector<1x6xf32>
    %c0_1 = arith.constant 0 : index
    %4 = memref.load %arg0[%c0_1] : memref<1xf32, #tpu.memory_space<smem>>
    %5 = vector.broadcast %4 : f32 to vector<1x6xf32>
    %6 = arith.mulf %3, %5 : vector<1x6xf32>
    %7 = arith.mulf %2, %6 : vector<1x6xf32>
    %c0_2 = arith.constant 0 : index
    %c0_3 = arith.constant 0 : index
    %8 = vector.load %arg2[%c0_2, %c0_3] : memref<3x6xf32, #tpu.memory_space<vmem>>, vector<1x6xf32>
    tpu.vector_store %arg2[%c0_2, %c0_3], %7 {strides = array<i32>} : memref<3x6xf32, #tpu.memory_space<vmem>>, vector<1x6xf32>,
    %cst = arith.constant 2.000000e+01 : f32
    %9 = vector.broadcast %cst : f32 to vector<1x6xf32>
    %10 = arith.addf %1, %9 : vector<1x6xf32>
    %c1 = arith.constant 1 : index
    %c0_4 = arith.constant 0 : index
    %11 = vector.load %arg2[%c1, %c0_4] : memref<3x6xf32, #tpu.memory_space<vmem>>, vector<1x6xf32>
    tpu.vector_store %arg2[%c1, %c0_4], %10 {strides = array<i32>} : memref<3x6xf32, #tpu.memory_space<vmem>>, vector<1x6xf32>,
    %c2 = arith.constant 2 : index
    %c0_5 = arith.constant 0 : index
    %12 = vector.load %arg2[%c2, %c0_5] : memref<3x6xf32, #tpu.memory_space<vmem>>, vector<1x6xf32>
    tpu.vector_store %arg2[%c2, %c0_5], %3 {strides = array<i32>} : memref<3x6xf32, #tpu.memory_space<vmem>>, vector<1x6xf32>,
    return
  }
}

</mosaic_0001>

<bundles_post_ra>
// kernel: squeeze.3
= control target key start
LH: loop header
LB: loop body
LE: loop exit
PB: predicated region body
PF: predicated region fallthrough
CT: control target
= control target key end

     0   :  { %s85_s0 = inlined_call_operand.vmem [shape: f32[6], index: 0, kind: input, shape index: {}]   ;;  %s86_s1 = inlined_call_operand.hbm [shape: f32[1,2,3], index: 1, kind: output, shape index: {}]  }
   0x1   :  { %v5_v0 = vld [vmem:[%s85_s0] sm:$0x1] }
   0x2   :  { %2 = vsyncpa [#allocation1], 0  ;;  %6 = vst [vmem:[#allocation3] sm:$0x1] %v5_v0  ;;  %vm8_vm0 = vcmask 23552   ;;  %s58_s0 = smov 125  }
   0x3   :  { %s59_s8 = smov [#allocation0]  }
   0x4   :  { %s26_s9 = sshll.u32 %s59_s8, 4  ;;  %s27_s9 = int_to_ptr.vmem [resolvable:$true] %s26_s9 }
   0x5   :  { %s34_s10 = scalar_lea.vmem %s27_s9, 32  ;;  %p39_p1 = scmp.lt.s32.totalorder %s27_s9, %s27_s9 }
   0x6   :  { %p35_p0 = scmp.ne.s32.totalorder %s27_s9, %s34_s10  ;;  %p40_p2 = scmp.lt.s32.totalorder %s34_s10, %s34_s10 }
   0x8   :  { %p41_p3 = por %p40_p2, %p39_p1 }
   0x9   :  { %v10_v1 = vld [vmem:[#allocation3] sm:$0x1]  }
   0xa   :  { %v7_v2 = vld [vmem:[#allocation3] sm:$0x1]   ;;  %11 = vrot.lane.b32.xlu0 %v10_v1, %s58_s0  ;;  %p42_p4 = pnand %p41_p3, %p35_p0 }
   0xb   :  { %9 = vst.msk [vmem:[#allocation2] sm:$0x1] %vm8_vm0, %v7_v2  }
  0x7c   :  { %v12_v3 = vpop.permute.xlu0 %11  }
  0x7d   :  { %15 = vst.msk [vmem:[#allocation2 + $0x1] sm:$0x1] %vm8_vm0, %v12_v3  }
  0x84   :  { %v19_v4 = vld [vmem:[#allocation2] sm:$0x3] }
  0x85   :  { %21 = vst [vmem:[#allocation0] sm:$0x3] %v19_v4 }
  0x86   :  { %45 = shalt.err (!%p42_p4)
}
  0x87   :  { %s46_s13 = scalar_lea.hbm %s86_s1, 32 }
  0x88   :  { %p47_p5 = scmp.ne.s32.totalorder %s86_s1, %s46_s13  ;;  %p50_p6 = scmp.lt.u32.totalorder %s46_s13, %s86_s1 }
  0x8a   :  { %p52_p7 = pnand %p50_p6, %p47_p5 }
  0x8c   :  { %55 = shalt.err (!%p52_p7)
}
  0x8d   :  { %29 = dma.vmem_to_hbm [thread:$0]  %s27_s9, 32, %s86_s1, [#allocation1]  }
  0x8e   :  { %56 = dma.done.wait [#allocation1], 32  }
  0x8f   :  { %57 = vsyncadd [#allocation1], 4294967264 }
  0x90   :  { %31 = vsyncpa [#allocation1], 1 }

// kernel: model_forward.1
= control target key start
LH: loop header
LB: loop body
LE: loop exit
PB: predicated region body
PF: predicated region fallthrough
CT: control target
= control target key end

     0   :  { %vm25_vm0 = vcmask 43010   ;;  %vm23_vm1 = vcmask 40960   ;;  %vm20_vm2 = vcmask 41985   ;;  %s61_s0 = inlined_call_operand.<no memory space> [shape: f32[1], index: 0, kind: input, shape index: {}]   ;;  %s62_s1 = inlined_call_operand.vmem [shape: f32[3,6], index: 1, kind: input, shape index: {}, may-alias: {1,2}]   ;;  %s63_s2 = inlined_call_operand.vmem [shape: f32[3,6], index: 2, kind: output, shape index: {}, may-alias: {1,2}]  }
   0x1   :  { %v12_v0 = vld [vmem:[%s62_s1] sm:$0x7]  ;;  %v14_v1 = vstv %s61_s0 }
   0x2   :  { %v15_v2 = vmul.f32 %v14_v1, %v12_v0  ;;  %v22_v3 = vadd.f32 20.0, %v12_v0  ;;  %26 = vst.msk [vmem:[%s63_s2] sm:$0x4] %vm25_vm0, %v12_v0 }
   0x4   :  { %v17_v4 = vrot.slane %v15_v2, 1  ;;  %24 = vst.msk [vmem:[%s63_s2 + $0x1] sm:$0x1] %vm23_vm1, %v22_v3 }
   0x6   :  { %v19_v5 = vmul.f32 %v17_v4, %v12_v0 }
   0x8   :  { %21 = vst.msk [vmem:[%s63_s2 - $0x1] sm:$0x2] %vm20_vm2, %v19_v5 }

</bundles_post_ra>
